<compile_context>
chip_gen: v6e
topology: v6e:2x2x1
jax: 0.10.0
libtpu: 0.0.40
codegen_flags: <defaults>
</compile_context>

<pallas_src>
import functools

import jax
import jax.numpy as jnp
from jax.experimental import pallas as pl
from jax.experimental.pallas import tpu as pltpu

_C = 512       # lane width of a tile (multiple of 128)
_TR_MAX = 64   # row (sublane) tile cap: 64x512 f32 = 128 KiB out / 256 KiB in per step


def _row_tiling(n):
    """Padded row count (multiple of the row tile) and row tile for batch n."""
    rows = max(8, ((n + _C - 1) // _C + 7) // 8 * 8)   # sublane-aligned row count
    tr = min(_TR_MAX, rows)
    # v7x has 2 TensorCores: give the "parallel" axis >= 2 steps when there is
    # enough work to split (each step stays well above the ~0.35 us overhead point).
    if rows // tr < 2 and rows >= 16:
        tr = max(8, (rows // 2) // 8 * 8)
    rows = (rows + tr - 1) // tr * tr
    return rows, tr


def _m1_kernel(params_ref, x_ref, o_ref, *, fold):
    # params_ref : SMEM f32[12|16] = [W1 (4x2 row-major: 8), b1 (4), (w2 row: 4)]
    # x_ref      : VMEM (2, TR, C) -- packed input, feature index leading
    # o_ref      : VMEM (TR, C)    -- sublane/lane-dense output slab
    x0 = x_ref[0]   # (TR, C) : feature 0 of all rows in this tile
    x1 = x_ref[1]   # (TR, C) : feature 1

    # Start the accumulator at the bias constant 42.0 of the second linear.
    acc = jnp.full(x0.shape, 42.0, dtype=jnp.float32)

    # Unrolled over the 4 hidden units: pure VPU broadcast multiply-adds.
    #   h_j = relu(W1[j,0]*x0 + W1[j,1]*x1 + b1[j])   (abs(relu(.)) == relu(.))
    #   acc += w2[j] * h_j   (w2 pre-folded into W1/b1 when fold=True)
    for j in range(4):
        w0 = params_ref[2 * j]
        w1 = params_ref[2 * j + 1]
        b = params_ref[8 + j]
        h = jnp.maximum(w0 * x0 + w1 * x1 + b, 0.0)
        if fold:
            acc = acc + h
        else:
            acc = acc + params_ref[12 + j] * h

    o_ref[...] = acc


def m1_forward_packed(x_packed, params, *, fold, row_tile=None):
    """Core call. x_packed: (2, R, C) f32, params: f32[12|16]. Returns (R, C) f32."""
    _, rows, c = x_packed.shape
    if row_tile is None:
        row_tile = min(_TR_MAX, rows)
        while rows % row_tile:
            row_tile -= 8
    grid = rows // row_tile

    n_elems = rows * c
    flops_per_elem = 24 if fold else 28

    return pl.pallas_call(
        functools.partial(_m1_kernel, fold=fold),
        out_shape=jax.ShapeDtypeStruct((rows, c), jnp.float32),
        grid=(grid,),
        in_specs=[
            pl.BlockSpec(memory_space=pltpu.MemorySpace.SMEM),      # params (whole)
            pl.BlockSpec((2, row_tile, c), lambda i: (0, i, 0)),    # packed x tile
        ],
        out_specs=pl.BlockSpec((row_tile, c), lambda i: (i, 0)),
        compiler_params=pltpu.CompilerParams(
            dimension_semantics=("parallel",),
        ),
        cost_estimate=pl.CostEstimate(
            flops=flops_per_elem * n_elems,
            transcendentals=0,
            bytes_accessed=12 * n_elems + 64,
        ),
    )(params, x_packed)


def m1_forward(x1, w1, b1, w2):
    """x1: (N, 2), w1: (4, 2), b1: (4,), w2: (1, 4). Returns (N, 1) float32."""
    n = x1.shape[0]
    rows, tr = _row_tiling(n)

    w1 = jnp.asarray(w1, jnp.float32)
    b1 = jnp.asarray(b1, jnp.float32).reshape(-1)
    w2 = jnp.asarray(w2, jnp.float32).reshape(-1)

    # Fold w2 into (W1, b1) when it is concretely nonnegative:
    #   w2[j] * relu(z) == relu(w2[j] * z)  for w2[j] >= 0  (abs already elided).
    try:
        fold = bool(jnp.all(w2 >= 0.0))
    except jax.errors.ConcretizationTypeError:
        fold = False
    if fold:
        params = jnp.concatenate([(w1 * w2[:, None]).reshape(-1), b1 * w2])
    else:
        params = jnp.concatenate([w1.reshape(-1), b1, w2])

    # Layout plumbing (one extra HBM pass): pack the row-major (N, 2) input into
    # a sublane/lane-dense (2, rows, C) slab. Producers that can emit this
    # layout upstream should call m1_forward_packed directly and skip this pass.
    n_pad = rows * _C
    xp = jnp.pad(x1.astype(jnp.float32), ((0, n_pad - n), (0, 0)))
    xp = xp.reshape(rows, _C, 2).transpose(2, 0, 1)      # (2, rows, C)

    out = m1_forward_packed(xp, params, fold=fold, row_tile=tr)   # (rows, C)

    # The module contract is an (N, 1) output; this slice/reshape is a second,
    # lane-padded HBM pass -- consumers that can take the lane-dense slab should
    # use m1_forward_packed instead.
    return out.reshape(-1)[:n].reshape(n, 1)


def _reference(x1, w1, b1, w2):
    h = jnp.abs(jnp.maximum(x1 @ w1.T + b1, 0.0))
    return h @ w2.T + 42.0


if __name__ == "__main__":
    key = jax.random.PRNGKey(0)
    k_x, k_w1, k_b1, k_s, k_x2 = jax.random.split(key, 5)

    N, IN_F, OUT_F = 8, 2, 4

    # Deterministic "parameters" for nn.Linear(2, 4) (kaiming-uniform-ish range).
    bound = 1.0 / jnp.sqrt(IN_F)
    w1 = jax.random.uniform(k_w1, (OUT_F, IN_F), jnp.float32, -bound, bound)
    b1 = jax.random.uniform(k_b1, (OUT_F,), jnp.float32, -bound, bound)

    # x5 stand-in: one uniform scalar broadcast to a (1, 4) second-linear weight.
    s = jax.random.uniform(k_s, (), jnp.float32)
    w2 = jnp.full((1, OUT_F), s, dtype=jnp.float32)

    # Small batch consistent with the module (exercises the folded kernel path).
    x_small = jax.random.normal(k_x, (N, IN_F), jnp.float32)
    out_small = jax.block_until_ready(m1_forward(x_small, w1, b1, w2))
    ref_small = _reference(x_small, w1, b1, w2)
    assert out_small.shape == (N, 1)
    assert jnp.allclose(out_small, ref_small, atol=1e-5, rtol=1e-5)

    # Padding path with a non-multiple-of-128 batch.
    x_odd = jax.random.normal(k_x2, (333, IN_F), jnp.float32)
    out_odd = jax.block_until_ready(m1_forward(x_odd, w1, b1, w2))
    ref_odd = _reference(x_odd, w1, b1, w2)
    assert out_odd.shape == (333, 1)
    assert jnp.allclose(out_odd, ref_odd, atol=1e-5, rtol=1e-5)

    # Non-folded kernel path (w2 with negative entries -> fold disabled).
    w2_neg = jnp.array([[0.3, -0.7, 0.5, -0.2]], dtype=jnp.float32)
    out_neg = jax.block_until_ready(m1_forward(x_small, w1, b1, w2_neg))
    ref_neg = _reference(x_small, w1, b1, w2_neg)
    assert jnp.allclose(out_neg, ref_neg, atol=1e-5, rtol=1e-5)

    print("KERNEL_OK")
</pallas_src>

<mosaic_0001>
module attributes {stable_mosaic.version = 11 : i64} {
  func.func @_m1_kernel(%arg0: i32, %arg1: memref<12xf32, #tpu.memory_space<smem>>, %arg2: memref<2x8x512xf32, #tpu.memory_space<vmem>>, %arg3: memref<8x512xf32, #tpu.memory_space<vmem>>) attributes {dimension_semantics = [#tpu.dimension_semantics<parallel>], iteration_bounds = array<i64: 1>, scalar_prefetch = 0 : i64, scratch_operands = 0 : i64, tpu.core_type = #tpu.core_type<tc>, window_params = [{transform_indices = @transform_0, window_bounds = array<i64: 12>}, {transform_indices = @transform_1, window_bounds = array<i64: 2, 8, 512>}, {transform_indices = @transform_2, window_bounds = array<i64: 8, 512>}]} {
    %c0 = arith.constant 0 : index
    %c0_0 = arith.constant 0 : index
    %c0_1 = arith.constant 0 : index
    %0 = vector.load %arg2[%c0, %c0_0, %c0_1] : memref<2x8x512xf32, #tpu.memory_space<vmem>>, vector<1x8x512xf32>
    %1 = vector.shape_cast %0 : vector<1x8x512xf32> to vector<8x512xf32>
    %c1 = arith.constant 1 : index
    %c0_2 = arith.constant 0 : index
    %c0_3 = arith.constant 0 : index
    %2 = vector.load %arg2[%c1, %c0_2, %c0_3] : memref<2x8x512xf32, #tpu.memory_space<vmem>>, vector<1x8x512xf32>
    %3 = vector.shape_cast %2 : vector<1x8x512xf32> to vector<8x512xf32>
    %cst = arith.constant 4.200000e+01 : f32
    %4 = vector.broadcast %cst : f32 to vector<8x512xf32>
    %c0_4 = arith.constant 0 : index
    %5 = memref.load %arg1[%c0_4] : memref<12xf32, #tpu.memory_space<smem>>
    %c1_5 = arith.constant 1 : index
    %6 = memref.load %arg1[%c1_5] : memref<12xf32, #tpu.memory_space<smem>>
    %c8 = arith.constant 8 : index
    %7 = memref.load %arg1[%c8] : memref<12xf32, #tpu.memory_space<smem>>
    %8 = vector.broadcast %5 : f32 to vector<8x512xf32>
    %9 = arith.mulf %8, %1 : vector<8x512xf32>
    %10 = vector.broadcast %6 : f32 to vector<8x512xf32>
    %11 = arith.mulf %10, %3 : vector<8x512xf32>
    %12 = arith.addf %9, %11 : vector<8x512xf32>
    %13 = vector.broadcast %7 : f32 to vector<8x512xf32>
    %14 = arith.addf %12, %13 : vector<8x512xf32>
    %cst_6 = arith.constant 0.000000e+00 : f32
    %15 = vector.broadcast %cst_6 : f32 to vector<8x512xf32>
    %16 = arith.maximumf %14, %15 : vector<8x512xf32>
    %17 = arith.addf %4, %16 : vector<8x512xf32>
    %c2 = arith.constant 2 : index
    %18 = memref.load %arg1[%c2] : memref<12xf32, #tpu.memory_space<smem>>
    %c3 = arith.constant 3 : index
    %19 = memref.load %arg1[%c3] : memref<12xf32, #tpu.memory_space<smem>>
    %c9 = arith.constant 9 : index
    %20 = memref.load %arg1[%c9] : memref<12xf32, #tpu.memory_space<smem>>
    %21 = vector.broadcast %18 : f32 to vector<8x512xf32>
    %22 = arith.mulf %21, %1 : vector<8x512xf32>
    %23 = vector.broadcast %19 : f32 to vector<8x512xf32>
    %24 = arith.mulf %23, %3 : vector<8x512xf32>
    %25 = arith.addf %22, %24 : vector<8x512xf32>
    %26 = vector.broadcast %20 : f32 to vector<8x512xf32>
    %27 = arith.addf %25, %26 : vector<8x512xf32>
    %cst_7 = arith.constant 0.000000e+00 : f32
    %28 = vector.broadcast %cst_7 : f32 to vector<8x512xf32>
    %29 = arith.maximumf %27, %28 : vector<8x512xf32>
    %30 = arith.addf %17, %29 : vector<8x512xf32>
    %c4 = arith.constant 4 : index
    %31 = memref.load %arg1[%c4] : memref<12xf32, #tpu.memory_space<smem>>
    %c5 = arith.constant 5 : index
    %32 = memref.load %arg1[%c5] : memref<12xf32, #tpu.memory_space<smem>>
    %c10 = arith.constant 10 : index
    %33 = memref.load %arg1[%c10] : memref<12xf32, #tpu.memory_space<smem>>
    %34 = vector.broadcast %31 : f32 to vector<8x512xf32>
    %35 = arith.mulf %34, %1 : vector<8x512xf32>
    %36 = vector.broadcast %32 : f32 to vector<8x512xf32>
    %37 = arith.mulf %36, %3 : vector<8x512xf32>
    %38 = arith.addf %35, %37 : vector<8x512xf32>
    %39 = vector.broadcast %33 : f32 to vector<8x512xf32>
    %40 = arith.addf %38, %39 : vector<8x512xf32>
    %cst_8 = arith.constant 0.000000e+00 : f32
    %41 = vector.broadcast %cst_8 : f32 to vector<8x512xf32>
    %42 = arith.maximumf %40, %41 : vector<8x512xf32>
    %43 = arith.addf %30, %42 : vector<8x512xf32>
    %c6 = arith.constant 6 : index
    %44 = memref.load %arg1[%c6] : memref<12xf32, #tpu.memory_space<smem>>
    %c7 = arith.constant 7 : index
    %45 = memref.load %arg1[%c7] : memref<12xf32, #tpu.memory_space<smem>>
    %c11 = arith.constant 11 : index
    %46 = memref.load %arg1[%c11] : memref<12xf32, #tpu.memory_space<smem>>
    %47 = vector.broadcast %44 : f32 to vector<8x512xf32>
    %48 = arith.mulf %47, %1 : vector<8x512xf32>
    %49 = vector.broadcast %45 : f32 to vector<8x512xf32>
    %50 = arith.mulf %49, %3 : vector<8x512xf32>
    %51 = arith.addf %48, %50 : vector<8x512xf32>
    %52 = vector.broadcast %46 : f32 to vector<8x512xf32>
    %53 = arith.addf %51, %52 : vector<8x512xf32>
    %cst_9 = arith.constant 0.000000e+00 : f32
    %54 = vector.broadcast %cst_9 : f32 to vector<8x512xf32>
    %55 = arith.maximumf %53, %54 : vector<8x512xf32>
    %56 = arith.addf %43, %55 : vector<8x512xf32>
    %c0_10 = arith.constant 0 : index
    %c0_11 = arith.constant 0 : index
    %57 = vector.load %arg3[%c0_10, %c0_11] : memref<8x512xf32, #tpu.memory_space<vmem>>, vector<8x512xf32>
    tpu.vector_store %arg3[%c0_10, %c0_11], %56 {strides = array<i32>} : memref<8x512xf32, #tpu.memory_space<vmem>>, vector<8x512xf32>,
    return
  }
  func.func @transform_0(%arg0: i32) -> i32 {
    %c0_i32 = arith.constant 0 : i32
    %c0_i32_0 = arith.constant 0 : i32
    return %c0_i32 : i32
  }
  func.func @transform_1(%arg0: i32) -> (i32, i32, i32) {
    %c0_i32 = arith.constant 0 : i32
    %c0_i32_0 = arith.constant 0 : i32
    %c0_i32_1 = arith.constant 0 : i32
    return %c0_i32, %arg0, %c0_i32_0 : i32, i32, i32
  }
  func.func @transform_2(%arg0: i32) -> (i32, i32) {
    %c0_i32 = arith.constant 0 : i32
    %c0_i32_0 = arith.constant 0 : i32
    return %arg0, %c0_i32 : i32, i32
  }
}

</mosaic_0001>

<bundles_post_ra>
// kernel: tpu_custom_call.1
= control target key start
LH: loop header
LB: loop body
LE: loop exit
PB: predicated region body
PF: predicated region fallthrough
CT: control target
= control target key end

     0   :  { %7 = vsyncpa [#allocation5], 0  ;;  %s357_s0 = inlined_call_operand.hbm [shape: f32[12], index: 0, kind: input, shape index: {}]   ;;  %s358_s1 = inlined_call_operand.hbm [shape: f32[2,8,512], index: 1, kind: input, shape index: {}]   ;;  %s359_s2 = inlined_call_operand.hbm [shape: f32[8,512], index: 2, kind: output, shape index: {}]  }
   0x1   :  { %8 = vsyncpa [#allocation3], 0 }
   0x2   :  { %9 = vsyncpa [#allocation4], 0  ;;  %s256_s9 = smov [#allocation2]   ;;  %s257_s12 = smov [#allocation6]  }
   0x3   :  { %17 = dma.hbm_to_smem %s357_s0, 16, %s256_s9, [#allocation5]  }
   0x4   :  { %s23_s13 = sshll.u32 %s257_s12, 4  ;;  %s24_s13 = int_to_ptr.vmem [resolvable:$true] %s23_s13 }
   0x5   :  { %s218_s14 = scalar_lea.vmem %s24_s13, 1024  ;;  %p223_p1 = scmp.lt.s32.totalorder %s24_s13, %s24_s13 }
   0x6   :  { %p219_p0 = scmp.ne.s32.totalorder %s24_s13, %s218_s14  ;;  %p224_p2 = scmp.lt.s32.totalorder %s218_s14, %s218_s14 }
   0x8   :  { %p225_p3 = por %p224_p2, %p223_p1 }
   0xa   :  { %p226_p4 = pnand %p225_p3, %p219_p0 }
   0xc   :  { %229 = shalt.err (!%p226_p4)
}
   0xd   :  { %s258_s15 = smov 512   ;;  %s259_s16 = smov 32  }
   0xe   :  { %29 = dma.hbm_to_vmem [thread:$0]  %s358_s1, 1024, %s24_s13, [#allocation3], %s258_s15, %s258_s15, %s259_s16  }
   0xf   :  { %250 = dma.done.wait [#allocation5], 16  }
  0x10   :  { %251 = vsyncadd [#allocation5], 4294967280 }
  0x11   :  { %252 = dma.done.wait [#allocation3], 1024  }
  0x12   :  { %253 = vsyncadd [#allocation3], 4294966272 }
  0x13   :  { %36 = sfence }
  0x14   :  { %s46_s0 = sld [smem:[#allocation2]]  ;;  %v37_v0 = vld [vmem:[#allocation6] sm:$0xff]  ;;  %v38_v2 = vld [vmem:[#allocation6 + $0x8] sm:$0xff]  ;;  %v282_v4 = vld [vmem:[#allocation6 + $0x10] sm:$0xff]  ;;  %s260_s29 = smov [#allocation7]  }
  0x15   :  { %s186_s19 = sld [smem:[#allocation2 + $0x1]]  ;;  %v42_v1 = vld [vmem:[#allocation6 + $0x20] sm:$0xff]  ;;  %v43_v3 = vld [vmem:[#allocation6 + $0x28] sm:$0xff]  ;;  %v284_v5 = vld [vmem:[#allocation6 + $0x30] sm:$0xff]  ;;  %s176_s30 = sshll.u32 %s260_s29, 4  ;;  %s177_s30 = int_to_ptr.vmem [resolvable:$true] %s176_s30 }
  0x16   :  { %s187_s20 = sld [smem:[#allocation2 + $0x8]]  ;;  %v286_v7 = vld [vmem:[#allocation6 + $0x18] sm:$0xff]  ;;  %s230_s3 = scalar_lea.vmem %s177_s30, 512 }
  0x17   :  { %s188_s21 = sld [smem:[#allocation2 + $0x2]]  ;;  %v288_v8 = vld [vmem:[#allocation6 + $0x38] sm:$0xff]  ;;  %p231_p5 = scmp.ne.s32.totalorder %s177_s30, %s230_s3 }
  0x18   :  { %s189_s22 = sld [smem:[#allocation2 + $0x3]]  ;;  %p235_p6 = scmp.lt.s32.totalorder %s177_s30, %s177_s30 }
  0x19   :  { %s190_s23 = sld [smem:[#allocation2 + $0x9]]  ;;  %p236_p7 = scmp.lt.s32.totalorder %s230_s3, %s230_s3 }
  0x1a   :  { %v49_v6 = vstv %s46_s0  ;;  %s191_s1 = sld [smem:[#allocation2 + $0x4]] }
  0x1b   :  { %v50_v9 = vmul.f32 %v49_v6, %v37_v0  ;;  %v54_v10 = vstv %s186_s19  ;;  %s192_s24 = sld [smem:[#allocation2 + $0x5]]  ;;  %v51_v11 = vmul.f32 %v49_v6, %v38_v2  ;;  %v52_v14 = vmul.f32 %v49_v6, %v282_v4  ;;  %p237_p8 = por %p236_p7, %p235_p6 }
  0x1c   :  { %v55_v12 = vmul.f32 %v54_v10, %v42_v1  ;;  %s193_s25 = sld [smem:[#allocation2 + $0xa]]  ;;  %v56_v13 = vmul.f32 %v54_v10, %v43_v3  ;;  %v57_v15 = vmul.f32 %v54_v10, %v284_v5  ;;  %v292_v16 = vstv %s187_s20 }
  0x1d   :  { %v294_v17 = vstv %s188_s21  ;;  %s194_s26 = sld [smem:[#allocation2 + $0x6]]  ;;  %v297_v18 = vmul.f32 %v49_v6, %v286_v7  ;;  %v300_v19 = vmul.f32 %v54_v10, %v288_v8  ;;  %p238_p9 = pnand %p237_p8, %p231_p5 }
  0x1e   :  { %v59_v20 = vadd.f32 %v55_v12, %v50_v9  ;;  %v80_v21 = vmul.f32 %v294_v17, %v37_v0  ;;  %v303_v22 = vstv %s189_s22  ;;  %s195_s27 = sld [smem:[#allocation2 + $0x7]]  ;;  %v60_v23 = vadd.f32 %v56_v13, %v51_v11 }
  0x1f   :  { %v85_v24 = vmul.f32 %v303_v22, %v42_v1  ;;  %v306_v25 = vstv %s190_s23  ;;  %s196_s28 = sld [smem:[#allocation2 + $0xb]]  ;;  %v81_v26 = vmul.f32 %v294_v17, %v38_v2  ;;  %v86_v27 = vmul.f32 %v303_v22, %v43_v3 }
  0x20   :  { %v64_v28 = vadd.f32 %v292_v16, %v59_v20  ;;  %v311_v29 = vstv %s191_s1  ;;  %v65_v30 = vadd.f32 %v292_v16, %v60_v23  ;;  %v61_v31 = vadd.f32 %v57_v15, %v52_v14 }
  0x21   :  { %v89_v32 = vadd.f32 %v85_v24, %v80_v21  ;;  %v110_v33 = vmul.f32 %v311_v29, %v37_v0  ;;  %v114_v34 = vstv %s192_s24  ;;  %v90_v35 = vadd.f32 %v86_v27, %v81_v26 }
  0x22   :  { %v68_v36 = vmax.f32 %v64_v28, 0.0  ;;  %v115_v37 = vmul.f32 %v114_v34, %v42_v1  ;;  %v315_v38 = vstv %s193_s25  ;;  %v69_v39 = vmax.f32 %v65_v30, 0.0 }
  0x23   :  { %v94_v40 = vadd.f32 %v306_v25, %v89_v32  ;;  %v139_v41 = vstv %s194_s26  ;;  %v95_v42 = vadd.f32 %v306_v25, %v90_v35  ;;  %v111_v43 = vmul.f32 %v311_v29, %v38_v2 }
  0x24   :  { %v72_v44 = vadd.f32 42.0, %v68_v36  ;;  %v119_v45 = vadd.f32 %v115_v37, %v110_v33  ;;  %v140_v46 = vmul.f32 %v139_v41, %v37_v0  ;;  %v144_v47 = vstv %s195_s27 }
  0x25   :  { %v98_v48 = vmax.f32 %v94_v40, 0.0  ;;  %v145_v49 = vmul.f32 %v144_v47, %v42_v1  ;;  %v320_v50 = vstv %s196_s28  ;;  %v73_v51 = vadd.f32 42.0, %v69_v39 }
  0x26   :  { %v124_v52 = vadd.f32 %v315_v38, %v119_v45  ;;  %v99_v53 = vmax.f32 %v95_v42, 0.0  ;;  %v116_v54 = vmul.f32 %v114_v34, %v43_v3  ;;  %v141_v55 = vmul.f32 %v139_v41, %v38_v2 }
  0x27   :  { %v102_v56 = vadd.f32 %v98_v48, %v72_v44  ;;  %v149_v57 = vadd.f32 %v145_v49, %v140_v46  ;;  %v146_v58 = vmul.f32 %v144_v47, %v43_v3  ;;  %v66_v59 = vadd.f32 %v292_v16, %v61_v31 }
  0x28   :  { %v128_v60 = vmax.f32 %v124_v52, 0.0  ;;  %v103_v61 = vadd.f32 %v99_v53, %v73_v51  ;;  %v120_v62 = vadd.f32 %v116_v54, %v111_v43  ;;  %v82_v63 = vmul.f32 %v294_v17, %v282_v4 }
  0x29   :  { %v154_v0 = vadd.f32 %v320_v50, %v149_v57  ;;  %v150_v1 = vadd.f32 %v146_v58, %v141_v55  ;;  %v70_v6 = vmax.f32 %v66_v59, 0.0  ;;  %v87_v9 = vmul.f32 %v303_v22, %v284_v5 }
  0x2a   :  { %v132_v10 = vadd.f32 %v128_v60, %v102_v56  ;;  %v125_v2 = vadd.f32 %v315_v38, %v120_v62  ;;  %v112_v3 = vmul.f32 %v311_v29, %v282_v4  ;;  %v117_v11 = vmul.f32 %v114_v34, %v284_v5 }
  0x2b   :  { %v158_v12 = vmax.f32 %v154_v0, 0.0  ;;  %v155_v13 = vadd.f32 %v320_v50, %v150_v1  ;;  %v74_v14 = vadd.f32 42.0, %v70_v6  ;;  %v91_v15 = vadd.f32 %v87_v9, %v82_v63 }
  0x2c   :  { %v129_v20 = vmax.f32 %v125_v2, 0.0  ;;  %v121_v21 = vadd.f32 %v117_v11, %v112_v3  ;;  %v142_v23 = vmul.f32 %v139_v41, %v282_v4  ;;  %v147_v24 = vmul.f32 %v144_v47, %v284_v5 }
  0x2d   :  { %v162_v26 = vadd.f32 %v158_v12, %v132_v10  ;;  %v159_v27 = vmax.f32 %v155_v13, 0.0  ;;  %v96_v28 = vadd.f32 %v306_v25, %v91_v15  ;;  %v62_v30 = vadd.f32 %v300_v19, %v297_v18 }
  0x2e   :  { %v133_v31 = vadd.f32 %v129_v20, %v103_v61  ;;  %v126_v32 = vadd.f32 %v315_v38, %v121_v21  ;;  %v151_v33 = vadd.f32 %v147_v24, %v142_v23  ;;  %v83_v35 = vmul.f32 %v294_v17, %v286_v7 }
  0x2f   :  { %166 = vst [vmem:[#allocation7] sm:$0xff] %v162_v26  ;;  %v100_v36 = vmax.f32 %v96_v28, 0.0  ;;  %v67_v4 = vadd.f32 %v292_v16, %v62_v30  ;;  %v88_v5 = vmul.f32 %v303_v22, %v288_v8  ;;  %v113_v37 = vmul.f32 %v311_v29, %v286_v7 }
  0x30   :  { %v163_v39 = vadd.f32 %v159_v27, %v133_v31  ;;  %v130_v40 = vmax.f32 %v126_v32, 0.0  ;;  %v156_v18 = vadd.f32 %v320_v50, %v151_v33  ;;  %v118_v19 = vmul.f32 %v114_v34, %v288_v8 }
  0x31   :  { %v104_v42 = vadd.f32 %v100_v36, %v74_v14  ;;  %v71_v43 = vmax.f32 %v67_v4, 0.0  ;;  %v92_v44 = vadd.f32 %v88_v5, %v83_v35  ;;  %v143_v17 = vmul.f32 %v139_v41, %v286_v7 }
  0x32   :  { %167 = vst [vmem:[#allocation7 + $0x8] sm:$0xff] %v163_v39  ;;  %v160_v45 = vmax.f32 %v156_v18, 0.0  ;;  %v122_v16 = vadd.f32 %v118_v19, %v113_v37  ;;  %v148_v46 = vmul.f32 %v144_v47, %v288_v8 }
  0x33   :  { %v134_v22 = vadd.f32 %v130_v40, %v104_v42  ;;  %v75_v48 = vadd.f32 42.0, %v71_v43  ;;  %v97_v29 = vadd.f32 %v306_v25, %v92_v44 }
  0x34   :  { %v127_v49 = vadd.f32 %v315_v38, %v122_v16  ;;  %v152_v51 = vadd.f32 %v148_v46, %v143_v17 }
  0x35   :  { %v164_v52 = vadd.f32 %v160_v45, %v134_v22  ;;  %v101_v53 = vmax.f32 %v97_v29, 0.0 }
  0x36   :  { %v131_v34 = vmax.f32 %v127_v49, 0.0  ;;  %v157_v54 = vadd.f32 %v320_v50, %v152_v51 }
  0x37   :  { %168 = vst [vmem:[#allocation7 + $0x10] sm:$0xff] %v164_v52  ;;  %v105_v55 = vadd.f32 %v101_v53, %v75_v48 }
  0x38   :  { %v161_v7 = vmax.f32 %v157_v54, 0.0 }
  0x39   :  { %v135_v41 = vadd.f32 %v131_v34, %v105_v55 }
  0x3b   :  { %v165_v56 = vadd.f32 %v161_v7, %v135_v41 }
  0x3d   :  { %169 = vst [vmem:[#allocation7 + $0x18] sm:$0xff] %v165_v56 }
  0x3e   :  { %241 = shalt.err (!%p238_p9)
}
  0x3f   :  { %179 = dma.vmem_to_hbm [thread:$0]  %s177_s30, 512, %s359_s2, [#allocation4]  }
  0x40   :  { %254 = dma.done.wait [#allocation4], 512  }
  0x41   :  { %255 = vsyncadd [#allocation4], 4294966784 }
  0x42   :  { %183 = vsyncpa [#allocation3], 1 }
  0x43   :  { %184 = vsyncpa [#allocation4], 1 }
  0x44   :  { %185 = vsyncpa [#allocation5], 1 }

</bundles_post_ra>
